<compile_context>
chip_gen: v7x
topology: tpu7x:2x2x1
jax: 0.10.0
libtpu: 0.0.40
codegen_flags: <defaults>
</compile_context>

<pallas_src>
import jax
import jax.numpy as jnp
from jax.experimental import pallas as pl
from jax.experimental.pallas import tpu as pltpu

EMBEDDING_SIZE = 32                 # "embedding_size" global from predict_burn.py
E = EMBEDDING_SIZE
H1 = E // 2                         # 16
H2 = E // 4                         # 8
H3 = 3                              # real layer-3 width
H3P = 8                             # layer-3 width padded to sublane multiple

# Row offsets of each (in, out) weight inside the packed (96, 128) buffer.
_W1_R0, _W1_R1 = 0, 2 * E           # (64, 16)
_W2_R0, _W2_R1 = _W1_R1, _W1_R1 + H1    # (16, 8)
_W3_R0, _W3_R1 = _W2_R1, _W2_R1 + H2    # (8, 8)   cols 3:8 zero-padded
_W4_R0, _W4_R1 = _W3_R1, _W3_R1 + H3P   # (8, 32)  rows 3:8 zero-padded
_W_ROWS = _W4_R1                    # 96
_W_COLS = 128                       # lane-aligned


def mlp_kernel(x_ref, w_ref, b_ref, o_ref):
    x = x_ref[...]                                # (TB, 2E) f32 (already f32)
    xr = x[:, :E]                                 # residual, keep only E lanes live

    h = jnp.dot(x, w_ref[_W1_R0:_W1_R1, 0:H1],
                preferred_element_type=jnp.float32) + b_ref[0:1, 0:H1]
    h = jnp.maximum(h, 0.0)                       # (TB, 16)

    h = jnp.dot(h, w_ref[_W2_R0:_W2_R1, 0:H2],
                preferred_element_type=jnp.float32) + b_ref[1:2, 0:H2]
    h = jnp.maximum(h, 0.0)                       # (TB, 8)

    h = jnp.dot(h, w_ref[_W3_R0:_W3_R1, 0:H3P],
                preferred_element_type=jnp.float32) + b_ref[2:3, 0:H3P]
    h = jnp.maximum(h, 0.0)                       # (TB, 8)  cols 3:8 are exactly 0

    h = jnp.dot(h, w_ref[_W4_R0:_W4_R1, 0:E],
                preferred_element_type=jnp.float32) + b_ref[3:4, 0:E]
    o_ref[...] = h + xr                           # (TB, E)


def init_linear(key, fan_in, fan_out):
    """PyTorch nn.Linear default init: U(-1/sqrt(fan_in), 1/sqrt(fan_in)).
    Weight returned already transposed to (in, out); bias as (fan_out,)."""
    kw, kb = jax.random.split(key)
    bound = 1.0 / jnp.sqrt(jnp.float32(fan_in))
    w = jax.random.uniform(kw, (fan_in, fan_out), jnp.float32, -bound, bound)
    b = jax.random.uniform(kb, (fan_out,), jnp.float32, -bound, bound)
    return w, b


def pack_params(params):
    """Pack 4 weights into one (96,128) buffer and 4 biases into one (8,128)."""
    (w1, b1), (w2, b2), (w3, b3), (w4, b4) = params
    wpack = jnp.zeros((_W_ROWS, _W_COLS), jnp.float32)
    wpack = wpack.at[_W1_R0:_W1_R1, 0:H1].set(w1)
    wpack = wpack.at[_W2_R0:_W2_R1, 0:H2].set(w2)
    wpack = wpack.at[_W3_R0:_W3_R1, 0:H3].set(w3)   # cols H3:H3P stay zero
    wpack = wpack.at[_W4_R0:_W4_R0 + H3, 0:E].set(w4)  # rows H3:H3P stay zero
    bpack = jnp.zeros((8, 128), jnp.float32)
    bpack = bpack.at[0, 0:H1].set(b1)
    bpack = bpack.at[1, 0:H2].set(b2)
    bpack = bpack.at[2, 0:H3].set(b3)               # cols H3:H3P stay zero
    bpack = bpack.at[3, 0:E].set(b4)
    return wpack, bpack


def neural_network_forward(x, params, *, tb=None):
    """x: (B, ...) flattened to (B, 2*E). Returns (B, E)."""
    B = x.shape[0]
    x2d = x.reshape(B, -1).astype(jnp.float32)       # nn.Flatten()
    assert x2d.shape[1] == 2 * E

    wpack, bpack = pack_params(params)

    # Batch tile: big (>=512) for production batches, minimal multiple of 8
    # for tiny batches so we don't pad/DMA more than needed.
    if tb is None:
        tb = 512 if B >= 512 else max(8, ((B + 7) // 8) * 8)
    n_blocks = pl.cdiv(B, tb)
    b_pad = n_blocks * tb
    if b_pad != B:
        x2d = jnp.pad(x2d, ((0, b_pad - B), (0, 0)))  # pad rows are discarded below

    # VMEM budget: double-buffered x/out tiles + packed params + headroom.
    # Sized explicitly so large TB never trips the scoped default, while
    # staying well under v7x's 64 MiB physical VMEM.
    vmem_bytes = 4 * (tb * 2 * E * 4 + tb * E * 4) + (_W_ROWS + 8) * 128 * 4 + (1 << 20)
    vmem_limit = min(max(int(vmem_bytes), 4 << 20), 48 << 20)

    out = pl.pallas_call(
        mlp_kernel,
        out_shape=jax.ShapeDtypeStruct((b_pad, E), jnp.float32),
        grid=(n_blocks,),
        in_specs=[
            pl.BlockSpec((tb, 2 * E), lambda i: (i, 0)),        # activations, pipelined
            pl.BlockSpec((_W_ROWS, _W_COLS), lambda i: (0, 0)),  # packed weights, resident
            pl.BlockSpec((8, 128), lambda i: (0, 0)),            # packed biases, resident
        ],
        out_specs=pl.BlockSpec((tb, E), lambda i: (i, 0)),
        compiler_params=pltpu.CompilerParams(
            dimension_semantics=("parallel",),   # v7x: shard batch across both TCs
            vmem_limit_bytes=vmem_limit,
        ),
    )(x2d, wpack, bpack)
    return out[:B]


def reference_forward(x, params):
    """Pure-JAX reference of the PyTorch forward (for sanity checking)."""
    B = x.shape[0]
    x2d = x.reshape(B, -1).astype(jnp.float32)
    (w1, b1), (w2, b2), (w3, b3), (w4, b4) = params
    h = jnp.maximum(x2d @ w1 + b1, 0.0)
    h = jnp.maximum(h @ w2 + b2, 0.0)
    h = jnp.maximum(h @ w3 + b3, 0.0)
    h = h @ w4 + b4
    return h + x2d[:, : x2d.shape[1] // 2]


if __name__ == "__main__":
    B = 2

    key = jax.random.PRNGKey(0)
    kx, k1, k2, k3, k4, kx2 = jax.random.split(key, 6)

    # Input shaped (B, 2, E) so nn.Flatten() -> (B, 2*E) is exercised.
    x = jax.random.normal(kx, (B, 2, E), jnp.float32)

    params = (
        init_linear(k1, 2 * E, E // 2),   # Linear(2E, E/2)
        init_linear(k2, E // 2, E // 4),  # Linear(E/2, E/4)
        init_linear(k3, E // 4, 3),       # Linear(E/4, 3)
        init_linear(k4, 3, E),            # Linear(3, E)
    )

    # Small-batch path (single grid step, minimal tile).
    out = jax.block_until_ready(neural_network_forward(x, params))
    ref = reference_forward(x, params)
    assert out.shape == (B, E)
    assert jnp.allclose(out, ref, atol=1e-5, rtol=1e-5)

    # Gridded + padded path (multiple grid steps, TB=512, batch not a tile multiple).
    B2 = 520
    x2 = jax.random.normal(kx2, (B2, 2, E), jnp.float32)
    out2 = jax.block_until_ready(neural_network_forward(x2, params))
    ref2 = reference_forward(x2, params)
    assert out2.shape == (B2, E)
    assert jnp.allclose(out2, ref2, atol=1e-5, rtol=1e-5)

    print("KERNEL_OK")
</pallas_src>

<mosaic_0001>
module attributes {stable_mosaic.version = 11 : i64} {
  func.func @mlp_kernel(%arg0: i32, %arg1: memref<8x64xf32, #tpu.memory_space<vmem>>, %arg2: memref<96x128xf32, #tpu.memory_space<vmem>>, %arg3: memref<8x128xf32, #tpu.memory_space<vmem>>, %arg4: memref<8x32xf32, #tpu.memory_space<vmem>>) attributes {dimension_semantics = [#tpu.dimension_semantics<parallel>], iteration_bounds = array<i64: 1>, scalar_prefetch = 0 : i64, scratch_operands = 0 : i64, tpu.core_type = #tpu.core_type<tc>, window_params = [{transform_indices = @transform_0, window_bounds = array<i64: 8, 64>}, {pipeline_mode = #tpu.pipeline_mode<synchronous>, transform_indices = @transform_1, window_bounds = array<i64: 96, 128>}, {pipeline_mode = #tpu.pipeline_mode<synchronous>, transform_indices = @transform_2, window_bounds = array<i64: 8, 128>}, {transform_indices = @transform_3, window_bounds = array<i64: 8, 32>}]} {
    %c0 = arith.constant 0 : index
    %c0_0 = arith.constant 0 : index
    %0 = vector.load %arg1[%c0, %c0_0] : memref<8x64xf32, #tpu.memory_space<vmem>>, vector<8x64xf32>
    %1 = vector.extract_strided_slice %0 {offsets = [0, 0], sizes = [8, 32], strides = [1, 1]} : vector<8x64xf32> to vector<8x32xf32>
    %c0_1 = arith.constant 0 : index
    %c0_2 = arith.constant 0 : index
    %2 = vector.load %arg2[%c0_1, %c0_2] : memref<96x128xf32, #tpu.memory_space<vmem>>, vector<64x16xf32>
    %cst = arith.constant dense<0.000000e+00> : vector<8x16xf32>
    %3 = tpu.matmul %0, %2, %cst {dimension_numbers = #tpu.dot_dimension_numbers<[1], [0], [0], [1], [0, 0, 1, 1], [], []>} : vector<8x64xf32>, vector<64x16xf32>, vector<8x16xf32> -> vector<8x16xf32>
    %c0_3 = arith.constant 0 : index
    %c0_4 = arith.constant 0 : index
    %4 = vector.load %arg3[%c0_3, %c0_4] : memref<8x128xf32, #tpu.memory_space<vmem>>, vector<1x16xf32>
    %5 = vector.broadcast %4 : vector<1x16xf32> to vector<8x16xf32>
    %6 = arith.addf %3, %5 : vector<8x16xf32>
    %cst_5 = arith.constant 0.000000e+00 : f32
    %7 = vector.broadcast %cst_5 : f32 to vector<8x16xf32>
    %8 = arith.maximumf %6, %7 : vector<8x16xf32>
    %c64 = arith.constant 64 : index
    %c0_6 = arith.constant 0 : index
    %9 = vector.load %arg2[%c64, %c0_6] : memref<96x128xf32, #tpu.memory_space<vmem>>, vector<16x8xf32>
    %cst_7 = arith.constant dense<0.000000e+00> : vector<8x8xf32>
    %10 = tpu.matmul %8, %9, %cst_7 {dimension_numbers = #tpu.dot_dimension_numbers<[1], [0], [0], [1], [0, 0, 1, 1], [], []>} : vector<8x16xf32>, vector<16x8xf32>, vector<8x8xf32> -> vector<8x8xf32>
    %c1 = arith.constant 1 : index
    %c0_8 = arith.constant 0 : index
    %11 = vector.load %arg3[%c1, %c0_8] : memref<8x128xf32, #tpu.memory_space<vmem>>, vector<1x8xf32>
    %12 = vector.broadcast %11 : vector<1x8xf32> to vector<8x8xf32>
    %13 = arith.addf %10, %12 : vector<8x8xf32>
    %cst_9 = arith.constant 0.000000e+00 : f32
    %14 = vector.broadcast %cst_9 : f32 to vector<8x8xf32>
    %15 = arith.maximumf %13, %14 : vector<8x8xf32>
    %c80 = arith.constant 80 : index
    %c0_10 = arith.constant 0 : index
    %16 = vector.load %arg2[%c80, %c0_10] : memref<96x128xf32, #tpu.memory_space<vmem>>, vector<8x8xf32>
    %cst_11 = arith.constant dense<0.000000e+00> : vector<8x8xf32>
    %17 = tpu.matmul %15, %16, %cst_11 {dimension_numbers = #tpu.dot_dimension_numbers<[1], [0], [0], [1], [0, 0, 1, 1], [], []>} : vector<8x8xf32>, vector<8x8xf32>, vector<8x8xf32> -> vector<8x8xf32>
    %c2 = arith.constant 2 : index
    %c0_12 = arith.constant 0 : index
    %18 = vector.load %arg3[%c2, %c0_12] : memref<8x128xf32, #tpu.memory_space<vmem>>, vector<1x8xf32>
    %19 = vector.broadcast %18 : vector<1x8xf32> to vector<8x8xf32>
    %20 = arith.addf %17, %19 : vector<8x8xf32>
    %cst_13 = arith.constant 0.000000e+00 : f32
    %21 = vector.broadcast %cst_13 : f32 to vector<8x8xf32>
    %22 = arith.maximumf %20, %21 : vector<8x8xf32>
    %c88 = arith.constant 88 : index
    %c0_14 = arith.constant 0 : index
    %23 = vector.load %arg2[%c88, %c0_14] : memref<96x128xf32, #tpu.memory_space<vmem>>, vector<8x32xf32>
    %cst_15 = arith.constant dense<0.000000e+00> : vector<8x32xf32>
    %24 = tpu.matmul %22, %23, %cst_15 {dimension_numbers = #tpu.dot_dimension_numbers<[1], [0], [0], [1], [0, 0, 1, 1], [], []>} : vector<8x8xf32>, vector<8x32xf32>, vector<8x32xf32> -> vector<8x32xf32>
    %c3 = arith.constant 3 : index
    %c0_16 = arith.constant 0 : index
    %25 = vector.load %arg3[%c3, %c0_16] : memref<8x128xf32, #tpu.memory_space<vmem>>, vector<1x32xf32>
    %26 = vector.broadcast %25 : vector<1x32xf32> to vector<8x32xf32>
    %27 = arith.addf %24, %26 : vector<8x32xf32>
    %28 = arith.addf %27, %1 : vector<8x32xf32>
    %c0_17 = arith.constant 0 : index
    %c0_18 = arith.constant 0 : index
    %29 = vector.load %arg4[%c0_17, %c0_18] : memref<8x32xf32, #tpu.memory_space<vmem>>, vector<8x32xf32>
    tpu.vector_store %arg4[%c0_17, %c0_18], %28 {strides = array<i32>} : memref<8x32xf32, #tpu.memory_space<vmem>>, vector<8x32xf32>,
    return
  }
  func.func @transform_0(%arg0: i32) -> (i32, i32) {
    %c0_i32 = arith.constant 0 : i32
    %c0_i32_0 = arith.constant 0 : i32
    return %arg0, %c0_i32 : i32, i32
  }
  func.func @transform_1(%arg0: i32) -> (i32, i32) {
    %c0_i32 = arith.constant 0 : i32
    %c0_i32_0 = arith.constant 0 : i32
    %c0_i32_1 = arith.constant 0 : i32
    return %c0_i32, %c0_i32_0 : i32, i32
  }
  func.func @transform_2(%arg0: i32) -> (i32, i32) {
    %c0_i32 = arith.constant 0 : i32
    %c0_i32_0 = arith.constant 0 : i32
    %c0_i32_1 = arith.constant 0 : i32
    return %c0_i32, %c0_i32_0 : i32, i32
  }
  func.func @transform_3(%arg0: i32) -> (i32, i32) {
    %c0_i32 = arith.constant 0 : i32
    %c0_i32_0 = arith.constant 0 : i32
    return %arg0, %c0_i32 : i32, i32
  }
}

</mosaic_0001>

<bundles_post_ra>
// kernel: tpu_custom_call.1
= control target key start
LH: loop header
LB: loop body
LE: loop exit
PB: predicated region body
PF: predicated region fallthrough
CT: control target
= control target key end

     0   :  { %8 = vsyncpa [#allocation3], 0  ;;  %s661_s0 = inlined_call_operand.hbm [shape: f32[8,64], index: 0, kind: input, shape index: {}]   ;;  %s662_s1 = inlined_call_operand.hbm [shape: f32[96,128], index: 1, kind: input, shape index: {}]   ;;  %s663_s2 = inlined_call_operand.hbm [shape: f32[8,128], index: 2, kind: input, shape index: {}]   ;;  %s664_s3 = inlined_call_operand.hbm [shape: f32[8,32], index: 3, kind: output, shape index: {}]  }
   0x1   :  { %9 = vsyncpa [#allocation6], 0 }
   0x2   :  { %10 = vsyncpa [#allocation4], 0  ;;  %s580_s12 = smov [#allocation5]   ;;  %s486_s16 = scalar_lea.hbm %s662_s1, 1536 }
   0x3   :  { %s26_s13 = sshll.u32 %s580_s12, 4  ;;  %p487_p0 = scmp.ne.s32.totalorder %s662_s1, %s486_s16  ;;  %s27_s13 = int_to_ptr.vmem [resolvable:$true] %s26_s13 }
   0x4   :  { %p490_p1 = scmp.lt.u32.totalorder %s486_s16, %s662_s1 }
   0x6   :  { %p492_p2 = pnand %p490_p1, %p487_p0 }
   0x8   :  { %495 = shalt.err (!%p492_p2)
}
   0x9   :  { %s496_s21 = scalar_lea.vmem %s27_s13, 1536  ;;  %p501_p4 = scmp.lt.s32.totalorder %s27_s13, %s27_s13 }
   0xa   :  { %p497_p3 = scmp.ne.s32.totalorder %s27_s13, %s496_s21  ;;  %p502_p5 = scmp.lt.s32.totalorder %s496_s21, %s496_s21 }
   0xc   :  { %p503_p6 = por %p502_p5, %p501_p4 }
   0xe   :  { %p504_p7 = pnand %p503_p6, %p497_p3 }
  0x10   :  { %507 = shalt.err (!%p504_p7)
}
  0x11   :  { %s581_s22 = smov 128   ;;  %s582_s23 = smov 8  }
  0x12   :  { %32 = dma.hbm_to_vmem [thread:$0]  %s662_s1, 1536, %s27_s13, [#allocation6], %s581_s22, %s581_s22, %s582_s23  }
  0x13   :  { %s583_s26 = smov [#allocation2]   ;;  %s584_s28 = smov [#allocation7]  }
  0x14   :  { %s17_s27 = sshll.u32 %s583_s26, 4  ;;  %s39_s29 = sshll.u32 %s584_s28, 4  ;;  %s18_s27 = int_to_ptr.vmem [resolvable:$true] %s17_s27  ;;  %s40_s29 = int_to_ptr.vmem [resolvable:$true] %s39_s29 }
  0x15   :  { %s508_s5 = scalar_lea.hbm %s661_s0, 128 }
  0x16   :  { %p509_p8 = scmp.ne.s32.totalorder %s661_s0, %s508_s5  ;;  %p512_p9 = scmp.lt.u32.totalorder %s508_s5, %s661_s0 }
  0x18   :  { %p514_p10 = pnand %p512_p9, %p509_p8 }
  0x1a   :  { %517 = shalt.err (!%p514_p10)
}
  0x1b   :  { %s518_s1 = scalar_lea.vmem %s18_s27, 128  ;;  %p523_p12 = scmp.lt.s32.totalorder %s18_s27, %s18_s27 }
  0x1c   :  { %p519_p11 = scmp.ne.s32.totalorder %s18_s27, %s518_s1  ;;  %p524_p13 = scmp.lt.s32.totalorder %s518_s1, %s518_s1 }
  0x1e   :  { %p525_p0 = por %p524_p13, %p523_p12 }
  0x20   :  { %p526_p1 = pnand %p525_p0, %p519_p11 }
  0x22   :  { %529 = shalt.err (!%p526_p1)
}
  0x23   :  { %20 = dma.hbm_to_vmem [thread:$0]  %s661_s0, 128, %s18_s27, [#allocation3]  }
  0x24   :  { %s530_s14 = scalar_lea.hbm %s663_s2, 128 }
  0x25   :  { %p531_p2 = scmp.ne.s32.totalorder %s663_s2, %s530_s14  ;;  %p534_p3 = scmp.lt.u32.totalorder %s530_s14, %s663_s2 }
  0x27   :  { %p536_p4 = pnand %p534_p3, %p531_p2 }
  0x29   :  { %539 = shalt.err (!%p536_p4)
}
  0x2a   :  { %s540_s19 = scalar_lea.vmem %s40_s29, 128  ;;  %p545_p6 = scmp.lt.s32.totalorder %s40_s29, %s40_s29 }
  0x2b   :  { %p541_p5 = scmp.ne.s32.totalorder %s40_s29, %s540_s19  ;;  %p546_p7 = scmp.lt.s32.totalorder %s540_s19, %s540_s19 }
  0x2d   :  { %p547_p8 = por %p546_p7, %p545_p6 }
  0x2f   :  { %p548_p9 = pnand %p547_p8, %p541_p5 }
  0x31   :  { %551 = shalt.err (!%p548_p9)
}
  0x32   :  { %42 = dma.hbm_to_vmem [thread:$0]  %s663_s2, 128, %s40_s29, [#allocation6]  }
  0x33   :  { %574 = dma.done.wait [#allocation3], 128  }
  0x34   :  { %575 = vsyncadd [#allocation3], 4294967168 }
  0x35   :  { %576 = dma.done.wait [#allocation6], 1664  }
  0x36   :  { %577 = vsyncadd [#allocation6], 4294965632  ;;  %v585_v0 = vmov 0.0|0.0   ;;  %vm586_vm0 = vmmov 0   ;;  %v587_v1 = vmov 0.0   ;;  %v53_v2 = vld [vmem:[#allocation5] sm:$0xff] }
  0x37   :  { %462 = vmatprep.subr.bf16.mxu0 %v585_v0  ;;  %442 = vmatprep.mubr.msk.f32.mxu0 %vm586_vm0, %v587_v1  ;;  %v54_v3 = vld [vmem:[#allocation5 + $0x8] sm:$0xff]  ;;  %v55_v4 = vld [vmem:[#allocation5 + $0x10] sm:$0xff]  ;;  %v56_v6 = vld [vmem:[#allocation5 + $0x18] sm:$0xff]  ;;  %vm66_vm1 = vcmask 523264   ;;  %vm148_vm2 = vcmask 130048   ;;  %vm229_vm3 = vcmask 64512  }
  0x38   :  { %474 = vmatprep.subr.bf16.mxu1 %v585_v0  ;;  %449 = vmatprep.mubr.msk.f32.mxu1 %vm586_vm0, %v587_v1  ;;  %v463_v5 = vpack.c.bf16 %v54_v3, %v53_v2  ;;  %v466_v7 = vpack.c.bf16 %v56_v6, %v55_v4  ;;  %v57_v8 = vld [vmem:[#allocation5 + $0x20] sm:$0xff]  ;;  %v58_v9 = vld [vmem:[#allocation5 + $0x28] sm:$0xff]  ;;  %v59_v11 = vld [vmem:[#allocation5 + $0x30] sm:$0xff]  ;;  %s588_s2 = smov [#allocation8]   ;;  %vm384_vm4 = vcmask 261120  }
  0x39   :  { %v469_v10 = vpack.c.bf16 %v58_v9, %v57_v8  ;;  %v60_v12 = vld [vmem:[#allocation5 + $0x38] sm:$0xff]  ;;  %v141_v15 = vld [vmem:[#allocation5 + $0x40] sm:$0xff]  ;;  %v142_v16 = vld [vmem:[#allocation5 + $0x48] sm:$0xff]  ;;  %s392_s21 = sshll.u32 %s588_s2, 4  ;;  %s393_s21 = int_to_ptr.vmem [resolvable:$true] %s392_s21 }
  0x3a   :  { %464 = vmatpush3.bf16.msra.mxu0 %v463_v5  ;;  %v472_v13 = vpack.c.bf16 %v60_v12, %v59_v11  ;;  %v52_v14 = vld [vmem:[#allocation2] sm:$0xff]  ;;  %v475_v17 = vpack.c.bf16 %v142_v16, %v141_v15  ;;  %v402_v18 = vld [vmem:[#allocation7] ss:$0 sm:$0xff]  ;;  %v223_v23 = vld [vmem:[#allocation5 + $0x50] sm:$0xff]  ;;  %s552_s22 = scalar_lea.vmem %s393_s21, 128  ;;  %p557_p11 = scmp.lt.s32.totalorder %s393_s21, %s393_s21 }
  0x3b   :  { %465 = vmatprep.subr.bf16.mxu0 %v585_v0  ;;  %v404_v24 = vld [vmem:[#allocation7 + $0x1] ss:$0 sm:$0xff]  ;;  %v304_v29 = vld [vmem:[#allocation5 + $0x58] sm:$0xff]  ;;  %v406_v30 = vld [vmem:[#allocation7 + $0x2] ss:$0 sm:$0xff]  ;;  %p553_p10 = scmp.ne.s32.totalorder %s393_s21, %s552_s22  ;;  %p558_p12 = scmp.lt.s32.totalorder %s552_s22, %s552_s22 }
  0x3c   :  { %476 = vmatpush3.bf16.msra.mxu1 %v475_v17  ;;  %v408_v35 = vld [vmem:[#allocation7 + $0x3] ss:$0 sm:$0xff] }
  0x3d   :  { %452 = vmatprep.subr.mxu1 %v587_v1  ;;  %p559_p13 = por %p558_p12, %p557_p11 }
  0x3e   :  { %467 = vmatpush3.bf16.msra.mxu0 %v466_v7 }
  0x3f   :  { %468 = vmatprep.subr.bf16.mxu0 %v585_v0  ;;  %p560_p0 = pnand %p559_p13, %p553_p10 }
  0x42   :  { %470 = vmatpush3.bf16.msra.mxu0 %v469_v10 }
  0x43   :  { %471 = vmatprep.subr.bf16.mxu0 %v585_v0 }
  0x46   :  { %473 = vmatpush3.bf16.msra.mxu0 %v472_v13 }
  0x49   :  { %443 = vmatmul.mubr.msk.f32.vlgmr.msra.gmra.mrb[0].mxu0 %vm66_vm1, %v52_v14 }
 0x11c   :  { %v136_v19 = vpop.f32.mrb[0].mxu0 }
 0x11d   :  { %v137_v20 = vadd.f32 %v402_v18, %v136_v19  ;;  %v444_v21 = vpop.f32.mrb[1].mxu0 }
 0x11f   :  { %v140_v22 = vmax.f32 %v137_v20, 0.0 }
 0x121   :  { %450 = vmatmul.mubr.msk.f32.vlgmr.msra.gmra.mrb[0].mxu1 %vm148_vm2, %v140_v22 }
 0x122   :  { %454 = vmatprep.mubr.msk.f32.mxu1 %vm586_vm0, %v587_v1  ;;  %453 = vmatpush3.msra.mxu1 %v223_v23 }
 0x123   :  { %457 = vmatprep.subr.mxu1 %v587_v1 }
 0x1f4   :  { %v218_v25 = vpop.f32.mrb[0].mxu1 }
 0x1f5   :  { %v219_v26 = vadd.f32 %v404_v24, %v218_v25  ;;  %v451_v27 = vpop.f32.mrb[1].mxu1 }
 0x1f7   :  { %v222_v28 = vmax.f32 %v219_v26, 0.0 }
 0x1f9   :  { %455 = vmatmul.mubr.msk.f32.vlgmr.msra.gmra.mrb[2].mxu1 %vm229_vm3, %v222_v28 }
 0x1fa   :  { %459 = vmatprep.mubr.msk.f32.mxu1 %vm586_vm0, %v587_v1  ;;  %458 = vmatpush3.msra.mxu1 %v304_v29 }
 0x2cc   :  { %v299_v31 = vpop.f32.mrb[2].mxu1 }
 0x2cd   :  { %v300_v32 = vadd.f32 %v406_v30, %v299_v31  ;;  %v456_v33 = vpop.f32.mrb[3].mxu1 }
 0x2cf   :  { %v303_v34 = vmax.f32 %v300_v32, 0.0 }
 0x2d1   :  { %460 = vmatmul.mubr.msk.f32.vlgmr.msra.gmra.mrb[4].mxu1 %vm229_vm3, %v303_v34 }
 0x3a4   :  { %v379_v36 = vpop.f32.mrb[4].mxu1 }
 0x3a5   :  { %v380_v37 = vadd.f32 %v408_v35, %v379_v36  ;;  %v461_v38 = vpop.f32.mrb[5].mxu1 }
 0x3a7   :  { %v383_v39 = vadd.f32 %v380_v37, %v52_v14 }
 0x3a9   :  { %385 = vst.msk [vmem:[#allocation8] sm:$0xff] %vm384_vm4, %v383_v39 }
 0x3aa   :  { %563 = shalt.err (!%p560_p0)
}
 0x3ab   :  { %s564_s25 = scalar_lea.hbm %s664_s3, 128 }
 0x3ac   :  { %p565_p1 = scmp.ne.s32.totalorder %s664_s3, %s564_s25  ;;  %p568_p2 = scmp.lt.u32.totalorder %s564_s25, %s664_s3 }
 0x3ae   :  { %p570_p3 = pnand %p568_p2, %p565_p1 }
 0x3b0   :  { %573 = shalt.err (!%p570_p3)
}
 0x3b1   :  { %395 = dma.vmem_to_hbm [thread:$0]  %s393_s21, 128, %s664_s3, [#allocation4]  }
 0x3b2   :  { %578 = dma.done.wait [#allocation4], 128  }
 0x3b3   :  { %579 = vsyncadd [#allocation4], 4294967168 }
 0x3b4   :  { %399 = vsyncpa [#allocation3], 1 }
 0x3b5   :  { %400 = vsyncpa [#allocation6], 1 }
 0x3b6   :  { %401 = vsyncpa [#allocation4], 1 }

</bundles_post_ra>
